<compile_context>
chip_gen: v6e
topology: v6e:2x2x1
jax: 0.10.0
libtpu: 0.0.40
codegen_flags: <defaults>
</compile_context>

<pallas_src>
import functools

import jax
import jax.numpy as jnp
from jax.experimental import pallas as pl
from jax.experimental.pallas import tpu as pltpu


def _conv1d_block_kernel(x_ref, w_ref, gmat_ref, gmatt_ref, b_ref, gamma_ref,
                         beta_ref, o_ref, *, TB, L, K, C_out, n_groups, eps):
    # x_ref     : (TB, L + 2*pad, C_in)  padded NLC input, lane-dense on C_in
    # w_ref     : (K, C_in, C_out)
    # gmat_ref  : (C_out, n_groups) 0/1 group-indicator
    # gmatt_ref : (n_groups, C_out) its transpose
    # b_/gamma_/beta_ref : (1, C_out)
    # o_ref     : (TB, L, C_out)
    C_in = w_ref.shape[1]
    x = x_ref[...]                                   # (TB, Lp, C_in), one load

    # ---- Conv1d: K shifted slices -> 2-D MXU matmuls, f32 accumulate -------
    acc = None
    for k in range(K):                               # K is small & static
        xk = x[:, k:k + L, :].reshape(TB * L, C_in)  # merge leading dims
        pk = jnp.dot(xk, w_ref[k], preferred_element_type=jnp.float32)
        acc = pk if acc is None else acc + pk
    acc = acc + b_ref[...].astype(jnp.float32)       # (1, C_out) row broadcast
    acc3 = acc.reshape(TB, L, C_out)                 # (TB, L, C_out)

    # ---- GroupNorm: one-pass stats per (sample, group) ----------------------
    s1 = jnp.sum(acc3, axis=1)                       # (TB, C_out)
    s2 = jnp.sum(acc3 * acc3, axis=1)                # (TB, C_out)
    cnt = float((C_out // n_groups) * L)
    m1 = jnp.dot(s1, gmat_ref[...], preferred_element_type=jnp.float32) / cnt
    m2 = jnp.dot(s2, gmat_ref[...], preferred_element_type=jnp.float32) / cnt
    inv = jax.lax.rsqrt(m2 - m1 * m1 + eps)          # (TB, n_groups)
    mean_c = jnp.dot(m1, gmatt_ref[...], preferred_element_type=jnp.float32)
    inv_c = jnp.dot(inv, gmatt_ref[...], preferred_element_type=jnp.float32)
    # fold affine + normalization into one scale/shift per (sample, channel)
    scale = inv_c * gamma_ref[...].astype(jnp.float32)          # (TB, C_out)
    shift = beta_ref[...].astype(jnp.float32) - mean_c * scale  # (TB, C_out)
    gn = acc3 * scale[:, None, :] + shift[:, None, :]

    # ---- Mish with a single transcendental ----------------------------------
    # tanh(softplus(x)) == u / (u + 2) with u = e^x (e^x + 2).
    # Clamp the exp argument: for x > 20 the factor is 1.0 to f32 precision,
    # and clamping keeps u finite (no inf/NaN anywhere).
    t = jnp.exp(jnp.minimum(gn, 20.0))
    u = t * (t + 2.0)
    out = gn * (u / (u + 2.0))

    o_ref[...] = out.astype(o_ref.dtype)


def _pick_batch_block(B, L, Lp, C_in, C_out, itemsize, budget_bytes=8 << 20):
    """Largest divisor of B whose double-buffered I/O tiles plus f32 working
    set fit the budget, preferring a grid extent >= 2 so both v7x
    TensorCores get work."""
    per_sample = (2 * (Lp * C_in + L * C_out) * itemsize   # in + out, dbl-buf
                  + 4 * L * C_out * 4)                     # f32 temporaries
    cap = max(1, budget_bytes // max(per_sample, 1))
    divisors = [d for d in range(1, B + 1) if B % d == 0 and d <= cap]
    tb = max(divisors) if divisors else 1
    if tb == B and B > 1:
        halves = [d for d in divisors if d <= B // 2]
        if halves:
            tb = max(halves)
    return tb


def conv1d_block(x, weight, bias, gamma, beta, *, n_groups=8, eps=1e-5,
                 batch_block=None):
    """x: (B, C_in, L); weight: (C_out, C_in, K); bias/gamma/beta: (C_out,)."""
    B, C_in, L = x.shape
    C_out, _, K = weight.shape
    assert K % 2 == 1, "padding=K//2 only preserves length for odd K"
    assert C_out % n_groups == 0, "GroupNorm requires C_out % n_groups == 0"
    pad = K // 2
    Lp = L + 2 * pad

    # ---- glue in plain JAX: NCL -> padded NLC (one cheap copy, no K x blowup)
    x_nlc = jnp.transpose(x, (0, 2, 1))                               # (B, L, C_in)
    x_pad = jnp.pad(x_nlc, ((0, 0), (pad, pad), (0, 0)))              # (B, Lp, C_in)

    # weight as (K, C_in, C_out): w_k[k, c, o] = weight[o, c, k]
    w_k = jnp.transpose(weight, (2, 1, 0))

    # 0/1 group-indicator matrices for lane-friendly group reduce / expand
    gsz = C_out // n_groups
    gmat = (jnp.arange(C_out)[:, None] // gsz ==
            jnp.arange(n_groups)[None, :]).astype(jnp.float32)        # (C_out, G)
    gmat_t = gmat.T                                                   # (G, C_out)

    b2 = bias.reshape(1, C_out)
    ga2 = gamma.reshape(1, C_out)
    be2 = beta.reshape(1, C_out)

    TB = batch_block or _pick_batch_block(B, L, Lp, C_in, C_out,
                                          x.dtype.itemsize)
    assert B % TB == 0, "batch_block must divide batch"

    # explicit VMEM budget (double-buffered I/O + resident params + f32 temps),
    # capped so it is valid on v7x's 64 MiB VMEM as well as v5e/v6e.
    elt = x.dtype.itemsize
    vmem_est = (2 * (TB * Lp * C_in + TB * L * C_out) * elt
                + (K * C_in * C_out + 2 * C_out * n_groups + 3 * C_out) * elt
                + 6 * TB * L * C_out * 4 + TB * Lp * C_in * 4)
    vmem_limit = int(min(max(2 * vmem_est, 4 << 20), 32 << 20))

    kernel = functools.partial(_conv1d_block_kernel, TB=TB, L=L, K=K,
                               C_out=C_out, n_groups=n_groups, eps=eps)

    out_nlc = pl.pallas_call(
        kernel,
        out_shape=jax.ShapeDtypeStruct((B, L, C_out), x.dtype),
        grid_spec=pltpu.PrefetchScalarGridSpec(
            num_scalar_prefetch=0,
            grid=(B // TB,),
            in_specs=[
                pl.BlockSpec((TB, Lp, C_in), lambda b: (b, 0, 0)),
                pl.BlockSpec((K, C_in, C_out), lambda b: (0, 0, 0)),
                pl.BlockSpec((C_out, n_groups), lambda b: (0, 0)),
                pl.BlockSpec((n_groups, C_out), lambda b: (0, 0)),
                pl.BlockSpec((1, C_out), lambda b: (0, 0)),
                pl.BlockSpec((1, C_out), lambda b: (0, 0)),
                pl.BlockSpec((1, C_out), lambda b: (0, 0)),
            ],
            out_specs=pl.BlockSpec((TB, L, C_out), lambda b: (b, 0, 0)),
        ),
        compiler_params=pltpu.CompilerParams(
            dimension_semantics=("parallel",),
            vmem_limit_bytes=vmem_limit),
    )(x_pad, w_k, gmat, gmat_t, b2, ga2, be2)

    # back to PyTorch's NCL convention
    return jnp.transpose(out_nlc, (0, 2, 1))


def reference(x, weight, bias, gamma, beta, *, n_groups=8, eps=1e-5):
    """Pure-JAX reference matching PyTorch Conv1d -> GroupNorm -> Mish."""
    K = weight.shape[-1]
    y = jax.lax.conv_general_dilated(
        x.astype(jnp.float32), weight.astype(jnp.float32),
        window_strides=(1,), padding=[(K // 2, K // 2)],
        dimension_numbers=("NCH", "OIH", "NCH"))
    y = y + bias.reshape(1, -1, 1)
    B, C, L = y.shape
    g = y.reshape(B, n_groups, C // n_groups * L)
    mean = g.mean(axis=-1, keepdims=True)
    var = ((g - mean) ** 2).mean(axis=-1, keepdims=True)
    gn = ((g - mean) / jnp.sqrt(var + eps)).reshape(B, C, L)
    gn = gn * gamma.reshape(1, -1, 1) + beta.reshape(1, -1, 1)
    return gn * jnp.tanh(jnp.log1p(jnp.exp(gn)))


if __name__ == "__main__":
    B, C_in, C_out, K, L, n_groups = 2, 4, 16, 3, 16, 8

    key = jax.random.PRNGKey(0)
    k1, k2, k3 = jax.random.split(key, 3)

    # deterministic parameter init (Conv1d-style uniform; GroupNorm affine defaults)
    fan_in = C_in * K
    bound = 1.0 / (fan_in ** 0.5)
    weight = jax.random.uniform(k1, (C_out, C_in, K), jnp.float32, -bound, bound)
    bias = jax.random.uniform(k2, (C_out,), jnp.float32, -bound, bound)
    gamma = jnp.ones((C_out,), jnp.float32)
    beta = jnp.zeros((C_out,), jnp.float32)

    x = jax.random.normal(k3, (B, C_in, L), jnp.float32)

    out = conv1d_block(x, weight, bias, gamma, beta, n_groups=n_groups)
    out = jax.block_until_ready(out)

    ref = reference(x, weight, bias, gamma, beta, n_groups=n_groups)
    assert out.shape == (B, C_out, L)
    assert jnp.allclose(out, ref, atol=1e-4, rtol=1e-4), "mismatch vs reference"

    print("KERNEL_OK")
</pallas_src>

<mosaic_0001>
module attributes {stable_mosaic.version = 11 : i64} {
  func.func @_conv1d_block_kernel(%arg0: i32, %arg1: memref<1x18x4xf32, #tpu.memory_space<vmem>>, %arg2: memref<3x4x16xf32, #tpu.memory_space<vmem>>, %arg3: memref<16x8xf32, #tpu.memory_space<vmem>>, %arg4: memref<8x16xf32, #tpu.memory_space<vmem>>, %arg5: memref<1x16xf32, #tpu.memory_space<vmem>>, %arg6: memref<1x16xf32, #tpu.memory_space<vmem>>, %arg7: memref<1x16xf32, #tpu.memory_space<vmem>>, %arg8: memref<1x16x16xf32, #tpu.memory_space<vmem>>) attributes {dimension_semantics = [#tpu.dimension_semantics<parallel>], iteration_bounds = array<i64: 2>, scalar_prefetch = 0 : i64, scratch_operands = 0 : i64, tpu.core_type = #tpu.core_type<tc>, window_params = [{transform_indices = @transform_0, window_bounds = array<i64: 1, 18, 4>}, {pipeline_mode = #tpu.pipeline_mode<synchronous>, transform_indices = @transform_1, window_bounds = array<i64: 3, 4, 16>}, {pipeline_mode = #tpu.pipeline_mode<synchronous>, transform_indices = @transform_2, window_bounds = array<i64: 16, 8>}, {pipeline_mode = #tpu.pipeline_mode<synchronous>, transform_indices = @transform_3, window_bounds = array<i64: 8, 16>}, {pipeline_mode = #tpu.pipeline_mode<synchronous>, transform_indices = @transform_4, window_bounds = array<i64: 1, 16>}, {pipeline_mode = #tpu.pipeline_mode<synchronous>, transform_indices = @transform_5, window_bounds = array<i64: 1, 16>}, {pipeline_mode = #tpu.pipeline_mode<synchronous>, transform_indices = @transform_6, window_bounds = array<i64: 1, 16>}, {transform_indices = @transform_7, window_bounds = array<i64: 1, 16, 16>}]} {
    %c0 = arith.constant 0 : index
    %c0_0 = arith.constant 0 : index
    %c0_1 = arith.constant 0 : index
    %0 = vector.load %arg1[%c0, %c0_0, %c0_1] : memref<1x18x4xf32, #tpu.memory_space<vmem>>, vector<1x18x4xf32>
    %1 = vector.extract_strided_slice %0 {offsets = [0, 0, 0], sizes = [1, 16, 4], strides = [1, 1, 1]} : vector<1x18x4xf32> to vector<1x16x4xf32>
    %2 = vector.shape_cast %1 : vector<1x16x4xf32> to vector<16x4xf32>
    %c0_2 = arith.constant 0 : index
    %c0_3 = arith.constant 0 : index
    %c0_4 = arith.constant 0 : index
    %3 = vector.load %arg2[%c0_2, %c0_3, %c0_4] : memref<3x4x16xf32, #tpu.memory_space<vmem>>, vector<1x4x16xf32>
    %4 = vector.shape_cast %3 : vector<1x4x16xf32> to vector<4x16xf32>
    %cst = arith.constant dense<0.000000e+00> : vector<16x16xf32>
    %5 = tpu.matmul %2, %4, %cst {dimension_numbers = #tpu.dot_dimension_numbers<[1], [0], [0], [1], [0, 0, 1, 1], [], []>} : vector<16x4xf32>, vector<4x16xf32>, vector<16x16xf32> -> vector<16x16xf32>
    %6 = vector.extract_strided_slice %0 {offsets = [0, 1, 0], sizes = [1, 16, 4], strides = [1, 1, 1]} : vector<1x18x4xf32> to vector<1x16x4xf32>
    %7 = vector.shape_cast %6 : vector<1x16x4xf32> to vector<16x4xf32>
    %c1 = arith.constant 1 : index
    %c0_5 = arith.constant 0 : index
    %c0_6 = arith.constant 0 : index
    %8 = vector.load %arg2[%c1, %c0_5, %c0_6] : memref<3x4x16xf32, #tpu.memory_space<vmem>>, vector<1x4x16xf32>
    %9 = vector.shape_cast %8 : vector<1x4x16xf32> to vector<4x16xf32>
    %cst_7 = arith.constant dense<0.000000e+00> : vector<16x16xf32>
    %10 = tpu.matmul %7, %9, %cst_7 {dimension_numbers = #tpu.dot_dimension_numbers<[1], [0], [0], [1], [0, 0, 1, 1], [], []>} : vector<16x4xf32>, vector<4x16xf32>, vector<16x16xf32> -> vector<16x16xf32>
    %11 = arith.addf %5, %10 : vector<16x16xf32>
    %12 = vector.extract_strided_slice %0 {offsets = [0, 2, 0], sizes = [1, 16, 4], strides = [1, 1, 1]} : vector<1x18x4xf32> to vector<1x16x4xf32>
    %13 = vector.shape_cast %12 : vector<1x16x4xf32> to vector<16x4xf32>
    %c2 = arith.constant 2 : index
    %c0_8 = arith.constant 0 : index
    %c0_9 = arith.constant 0 : index
    %14 = vector.load %arg2[%c2, %c0_8, %c0_9] : memref<3x4x16xf32, #tpu.memory_space<vmem>>, vector<1x4x16xf32>
    %15 = vector.shape_cast %14 : vector<1x4x16xf32> to vector<4x16xf32>
    %cst_10 = arith.constant dense<0.000000e+00> : vector<16x16xf32>
    %16 = tpu.matmul %13, %15, %cst_10 {dimension_numbers = #tpu.dot_dimension_numbers<[1], [0], [0], [1], [0, 0, 1, 1], [], []>} : vector<16x4xf32>, vector<4x16xf32>, vector<16x16xf32> -> vector<16x16xf32>
    %17 = arith.addf %11, %16 : vector<16x16xf32>
    %c0_11 = arith.constant 0 : index
    %c0_12 = arith.constant 0 : index
    %18 = vector.load %arg5[%c0_11, %c0_12] : memref<1x16xf32, #tpu.memory_space<vmem>>, vector<1x16xf32>
    %19 = vector.broadcast %18 : vector<1x16xf32> to vector<16x16xf32>
    %20 = arith.addf %17, %19 : vector<16x16xf32>
    %21 = vector.shape_cast %20 : vector<16x16xf32> to vector<1x16x16xf32>
    %cst_13 = arith.constant dense<0.000000e+00> : vector<1x16xf32>
    %22 = vector.multi_reduction <add>, %21, %cst_13 [1] : vector<1x16x16xf32> to vector<1x16xf32>
    %23 = arith.mulf %21, %21 : vector<1x16x16xf32>
    %cst_14 = arith.constant dense<0.000000e+00> : vector<1x16xf32>
    %24 = vector.multi_reduction <add>, %23, %cst_14 [1] : vector<1x16x16xf32> to vector<1x16xf32>
    %c0_15 = arith.constant 0 : index
    %c0_16 = arith.constant 0 : index
    %25 = vector.load %arg3[%c0_15, %c0_16] : memref<16x8xf32, #tpu.memory_space<vmem>>, vector<16x8xf32>
    %cst_17 = arith.constant dense<0.000000e+00> : vector<1x8xf32>
    %26 = tpu.matmul %22, %25, %cst_17 {dimension_numbers = #tpu.dot_dimension_numbers<[1], [0], [0], [1], [0, 0, 1, 1], [], []>} : vector<1x16xf32>, vector<16x8xf32>, vector<1x8xf32> -> vector<1x8xf32>
    %cst_18 = arith.constant 3.200000e+01 : f32
    %27 = vector.broadcast %cst_18 : f32 to vector<1x8xf32>
    %28 = arith.divf %26, %27 : vector<1x8xf32>
    %c0_19 = arith.constant 0 : index
    %c0_20 = arith.constant 0 : index
    %29 = vector.load %arg3[%c0_19, %c0_20] : memref<16x8xf32, #tpu.memory_space<vmem>>, vector<16x8xf32>
    %cst_21 = arith.constant dense<0.000000e+00> : vector<1x8xf32>
    %30 = tpu.matmul %24, %29, %cst_21 {dimension_numbers = #tpu.dot_dimension_numbers<[1], [0], [0], [1], [0, 0, 1, 1], [], []>} : vector<1x16xf32>, vector<16x8xf32>, vector<1x8xf32> -> vector<1x8xf32>
    %cst_22 = arith.constant 3.200000e+01 : f32
    %31 = vector.broadcast %cst_22 : f32 to vector<1x8xf32>
    %32 = arith.divf %30, %31 : vector<1x8xf32>
    %33 = arith.mulf %28, %28 : vector<1x8xf32>
    %34 = arith.subf %32, %33 : vector<1x8xf32>
    %cst_23 = arith.constant 9.99999974E-6 : f32
    %35 = vector.broadcast %cst_23 : f32 to vector<1x8xf32>
    %36 = arith.addf %34, %35 : vector<1x8xf32>
    %37 = math.rsqrt %36 : vector<1x8xf32>
    %c0_24 = arith.constant 0 : index
    %c0_25 = arith.constant 0 : index
    %38 = vector.load %arg4[%c0_24, %c0_25] : memref<8x16xf32, #tpu.memory_space<vmem>>, vector<8x16xf32>
    %cst_26 = arith.constant dense<0.000000e+00> : vector<1x16xf32>
    %39 = tpu.matmul %28, %38, %cst_26 {dimension_numbers = #tpu.dot_dimension_numbers<[1], [0], [0], [1], [0, 0, 1, 1], [], []>} : vector<1x8xf32>, vector<8x16xf32>, vector<1x16xf32> -> vector<1x16xf32>
    %c0_27 = arith.constant 0 : index
    %c0_28 = arith.constant 0 : index
    %40 = vector.load %arg4[%c0_27, %c0_28] : memref<8x16xf32, #tpu.memory_space<vmem>>, vector<8x16xf32>
    %cst_29 = arith.constant dense<0.000000e+00> : vector<1x16xf32>
    %41 = tpu.matmul %37, %40, %cst_29 {dimension_numbers = #tpu.dot_dimension_numbers<[1], [0], [0], [1], [0, 0, 1, 1], [], []>} : vector<1x8xf32>, vector<8x16xf32>, vector<1x16xf32> -> vector<1x16xf32>
    %c0_30 = arith.constant 0 : index
    %c0_31 = arith.constant 0 : index
    %42 = vector.load %arg6[%c0_30, %c0_31] : memref<1x16xf32, #tpu.memory_space<vmem>>, vector<1x16xf32>
    %43 = arith.mulf %41, %42 : vector<1x16xf32>
    %c0_32 = arith.constant 0 : index
    %c0_33 = arith.constant 0 : index
    %44 = vector.load %arg7[%c0_32, %c0_33] : memref<1x16xf32, #tpu.memory_space<vmem>>, vector<1x16xf32>
    %45 = arith.mulf %39, %43 : vector<1x16xf32>
    %46 = arith.subf %44, %45 : vector<1x16xf32>
    %47 = vector.shape_cast %43 : vector<1x16xf32> to vector<1x1x16xf32>
    %48 = vector.broadcast %47 : vector<1x1x16xf32> to vector<1x16x16xf32>
    %49 = arith.mulf %21, %48 : vector<1x16x16xf32>
    %50 = vector.shape_cast %46 : vector<1x16xf32> to vector<1x1x16xf32>
    %51 = vector.broadcast %50 : vector<1x1x16xf32> to vector<1x16x16xf32>
    %52 = arith.addf %49, %51 : vector<1x16x16xf32>
    %cst_34 = arith.constant 2.000000e+01 : f32
    %53 = vector.broadcast %cst_34 : f32 to vector<1x16x16xf32>
    %54 = arith.minimumf %52, %53 : vector<1x16x16xf32>
    %55 = math.exp %54 : vector<1x16x16xf32>
    %cst_35 = arith.constant 2.000000e+00 : f32
    %56 = vector.broadcast %cst_35 : f32 to vector<1x16x16xf32>
    %57 = arith.addf %55, %56 : vector<1x16x16xf32>
    %58 = arith.mulf %55, %57 : vector<1x16x16xf32>
    %cst_36 = arith.constant 2.000000e+00 : f32
    %59 = vector.broadcast %cst_36 : f32 to vector<1x16x16xf32>
    %60 = arith.addf %58, %59 : vector<1x16x16xf32>
    %61 = arith.divf %58, %60 : vector<1x16x16xf32>
    %62 = arith.mulf %52, %61 : vector<1x16x16xf32>
    %c0_37 = arith.constant 0 : index
    %c0_38 = arith.constant 0 : index
    %c0_39 = arith.constant 0 : index
    %63 = vector.load %arg8[%c0_37, %c0_38, %c0_39] : memref<1x16x16xf32, #tpu.memory_space<vmem>>, vector<1x16x16xf32>
    tpu.vector_store %arg8[%c0_37, %c0_38, %c0_39], %62 {strides = array<i32>} : memref<1x16x16xf32, #tpu.memory_space<vmem>>, vector<1x16x16xf32>,
    return
  }
  func.func @transform_0(%arg0: i32) -> (i32, i32, i32) {
    %c0_i32 = arith.constant 0 : i32
    %c0_i32_0 = arith.constant 0 : i32
    %c0_i32_1 = arith.constant 0 : i32
    return %arg0, %c0_i32, %c0_i32_0 : i32, i32, i32
  }
  func.func @transform_1(%arg0: i32) -> (i32, i32, i32) {
    %c0_i32 = arith.constant 0 : i32
    %c0_i32_0 = arith.constant 0 : i32
    %c0_i32_1 = arith.constant 0 : i32
    %c0_i32_2 = arith.constant 0 : i32
    return %c0_i32, %c0_i32_0, %c0_i32_1 : i32, i32, i32
  }
  func.func @transform_2(%arg0: i32) -> (i32, i32) {
    %c0_i32 = arith.constant 0 : i32
    %c0_i32_0 = arith.constant 0 : i32
    %c0_i32_1 = arith.constant 0 : i32
    return %c0_i32, %c0_i32_0 : i32, i32
  }
  func.func @transform_3(%arg0: i32) -> (i32, i32) {
    %c0_i32 = arith.constant 0 : i32
    %c0_i32_0 = arith.constant 0 : i32
    %c0_i32_1 = arith.constant 0 : i32
    return %c0_i32, %c0_i32_0 : i32, i32
  }
  func.func @transform_4(%arg0: i32) -> (i32, i32) {
    %c0_i32 = arith.constant 0 : i32
    %c0_i32_0 = arith.constant 0 : i32
    %c0_i32_1 = arith.constant 0 : i32
    return %c0_i32, %c0_i32_0 : i32, i32
  }
  func.func @transform_5(%arg0: i32) -> (i32, i32) {
    %c0_i32 = arith.constant 0 : i32
    %c0_i32_0 = arith.constant 0 : i32
    %c0_i32_1 = arith.constant 0 : i32
    return %c0_i32, %c0_i32_0 : i32, i32
  }
  func.func @transform_6(%arg0: i32) -> (i32, i32) {
    %c0_i32 = arith.constant 0 : i32
    %c0_i32_0 = arith.constant 0 : i32
    %c0_i32_1 = arith.constant 0 : i32
    return %c0_i32, %c0_i32_0 : i32, i32
  }
  func.func @transform_7(%arg0: i32) -> (i32, i32, i32) {
    %c0_i32 = arith.constant 0 : i32
    %c0_i32_0 = arith.constant 0 : i32
    %c0_i32_1 = arith.constant 0 : i32
    return %arg0, %c0_i32, %c0_i32_0 : i32, i32, i32
  }
}

</mosaic_0001>

<bundles_post_ra>
// kernel: tpu_custom_call.1
= control target key start
LH: loop header
LB: loop body
LE: loop exit
PB: predicated region body
PF: predicated region fallthrough
CT: control target
= control target key end

     0   :  { %12 = vsyncpa [#allocation3], 0  ;;  %s1398_s0 = inlined_call_operand.vmem [shape: f32[2,18,4], index: 0, kind: input, shape index: {}]   ;;  %s1399_s1 = inlined_call_operand.vmem [shape: f32[3,4,16], index: 1, kind: input, shape index: {}]   ;;  %s1400_s2 = inlined_call_operand.vmem [shape: f32[16,8], index: 2, kind: input, shape index: {}]   ;;  %s1401_s3 = inlined_call_operand.vmem [shape: f32[8,16], index: 3, kind: input, shape index: {}]   ;;  %s1402_s4 = inlined_call_operand.vmem [shape: f32[1,16], index: 4, kind: input, shape index: {}]   ;;  %s1403_s5 = inlined_call_operand.vmem [shape: f32[1,16], index: 5, kind: input, shape index: {}]   ;;  %s1404_s6 = inlined_call_operand.vmem [shape: f32[1,16], index: 6, kind: input, shape index: {}]   ;;  %s1405_s7 = inlined_call_operand.hbm [shape: f32[2,16,16], index: 7, kind: output, shape index: {}]  }
   0x1   :  { %14 = vsyncpa [#allocation3 + $0x1], 0  ;;  %s1245_s24 = smov 0   ;;  %s1247_s25 = smov 0  }
   0x2   :  { %s1249_s26 = smov 0   ;;  %s1251_s27 = smov 0  }
   0x3 LB: > { %s1266_s28 = sadd.s32 4294967295, %s1198_s27   ;;  %s998_s29 = sadd.s32 4294967294, %s1198_s27   ;;  %s1198_s27 = sphi %s1251_s27, %s1411_s27   ;;  %s1194_s26 = sphi %s1249_s26, %s1410_s26   ;;  %s1190_s25 = sphi %s1247_s25, %s1409_s25   ;;  %s1186_s24 = sphi %s1245_s24, %s1408_s24  }
   0x4   : > { %s1270_s30 = sadd.s32 1, %s1198_s27   ;;  %s179_s8 = sadd.s32 1, %s1194_s26 }
   0x5   : > { %s176_s9 = ssub.s32 %s1198_s27, %s1270_s30  ;;  %p189_p0 = scmp.ne.s32.totalorder %s1194_s26, %s1190_s25 }
   0x6   : > { %p177_p1 = scmp.eq.s32.totalorder %s176_s9, 0  ;;  %p190_p2 = scmp.eq.s32.totalorder %s1266_s28, 1 }
   0x7   : > { %p195_p3 = scmp.ne.s32.totalorder %s1190_s25, %s1186_s24  ;;  %p196_p4 = scmp.eq.s32.totalorder %s998_s29, 1 }
   0x8   : > { %s1281_s10 = scalar_select %p177_p1, %s1194_s26, %s179_s8  }
   0x9   : > { %p1283_p5 = por %p190_p2, %p189_p0  ;;  %p1287_p6 = por %p196_p4, %p195_p3 }
   0xa   : > { %p1001_p7 = scmp.ge.s32.totalorder %s1198_s27, 1  ;;  %p240_p8 = scmp.lt.s32.totalorder %s1198_s27, 3 }
   0xc   : > { %p241_p9 = pnand %p1001_p7, %p240_p8 }
   0xd   : > { %p272_p10 = scmp.lt.s32.totalorder (!%p241_p9), %s1266_s28, 1  ;;  %s269_s22 = sand.u32 (!%p241_p9), 1, %s1190_s25  }
   0xe   : > { %244 = sbr.rel (%p241_p9) target bundleno = 722 (0x2d2), region = 48  ;;  %s1025_s29 = sshll.u32 (!%p241_p9), %s1266_s28, 8 }
   0xf   : > { %s1352_s15 = scalar_lea.hbm (!%p241_p9), %s1405_s7, %s1025_s29  ;;  %s1202_s17 = smov (!%p241_p9), [#allocation2]  }
  0x10   : > { %s1142_s18 = sshll.u32 (!%p241_p9), %s1202_s17, 4  ;;  %s1143_s18 = int_to_ptr.vmem [resolvable:$false] %s1142_s18 }
  0x13   : > { %v1004_v0 = vld [vmem:[%s1399_s1 + $0x4] sm:$0xf]  ;;  %vm297_vm0 = vcmask 1043456   ;;  %v280_v1 = vld [vmem:[%s1399_s1] sm:$0xf]  ;;  %s273_s19 = scalar_select %p272_p10, %s1266_s28, 1 }
  0x14   : > { %1045 = vmatprep.subr.msk.mxu0 %vm297_vm0, %v1004_v0  ;;  %1050 = vmatprep.subr.msk.mxu1 %vm297_vm0, %v280_v1  ;;  %v1011_v2 = vld [vmem:[%s1399_s1 + $0x8] sm:$0xf]  ;;  %vm292_vm1 = vcmask 31744   ;;  %vm286_vm2 = vcmask 1046528   ;;  %vm460_vm3 = vcmask 1045504   ;;  %v1200_v17 = vmov 0.0  }
  0x15   : > { %1046 = vmatpush3.msk.msra.mxu0 %vm297_vm0, %v1004_v0  ;;  %1051 = vmatpush3.msk.msra.mxu1 %vm297_vm0, %v280_v1  ;;  %s1084_s20 = smul.u32 24, %s273_s19  ;;  %v581_v16 = vld [vmem:[%s1400_s2 + $0x8] sm:$0xff]  ;;  %v580_v18 = vld [vmem:[%s1400_s2] sm:$0xff]  ;;  %vm1201_vm4 = vmmov 0   ;;  %vm559_vm5 = vcmask 130048   ;;  %vm736_vm6 = vcmask 64512   ;;  %v888_v1 = vlaneseq }
  0x16   : > { %1055 = vmatprep.subr.msk.mxu0 %vm297_vm0, %v1011_v2  ;;  %1060 = vmatprep.subr.mxu1 %v1200_v17  ;;  %v1015_v25 = vld [vmem:[%s1402_s4] ss:$0 sm:$0xff]  ;;  %s1358_s28 = scalar_lea.sflag [#allocation3], %s269_s22  ;;  %s1144_s19 = scalar_lea.vmem %s1143_s18, 512 }
  0x17   : > { %s276_s23 = scalar_lea.vmem %s1398_s0, %s1084_s20  ;;  %v735_v52 = vld [vmem:[%s1401_s3] sm:$0xff] }
  0x18   : > { %v277_v3 = vld [vmem:[%s276_s23] sm:$0xff]  ;;  %v278_v4 = vld [vmem:[%s276_s23 + $0x8] sm:$0xff]  ;;  %v279_v5 = vld [vmem:[%s276_s23 + $0x10] sm:$0x3]  ;;  %s1002_s23 = sshll.u32 %s269_s22, 4 }
  0x19   : > { %v287_v6 = vrot.slane %v277_v3, 1  ;;  %v288_v7 = vrot.slane %v278_v4, 1  ;;  %1052 = vmatprep.mubr.msk.f32.mxu1 %vm292_vm1, %v277_v3  ;;  %v290_v8 = vrot.slane %v279_v5, 1  ;;  %v464_v9 = vrot.slane %v279_v5, 2  ;;  %s271_s8 = scalar_lea.vmem [#allocation2], %s1002_s23 }
  0x1a   : > { %1053 = vmatmul.mubr.msk.f32.vlgmr.msra.gmra.mxu1 %vm292_vm1, %v278_v4  ;;  %v461_v10 = vrot.slane %v277_v3, 2  ;;  %v462_v11 = vrot.slane %v278_v4, 2  ;;  %v883_v3 = vld [vmem:[%s1403_s5] sm:$0x1]  ;;  %s936_s9 = sshll.u32 %s271_s8, 4  ;;  %s1354_s9 = int_to_ptr.vmem [resolvable:$true] %s936_s9 }
  0x1b   : > { %v289_v12 = vsel %vm286_vm2, %v287_v6, %v288_v7  ;;  %v291_v13 = vsel %vm286_vm2, %v288_v7, %v290_v8  ;;  %1061 = vmatpush3.msra.mxu1 %v581_v16  ;;  %1064 = vmatprep.mubr.msk.f32.mxu1 %vm1201_vm4, %v1200_v17  ;;  %v885_v7 = vld [vmem:[%s1404_s6] sm:$0x1]  ;;  %s1138_s16 = scalar_lea.vmem %s1354_s9, 256  ;;  %p1145_p0 = scmp.lt.s32.totalorder %s1354_s9, %s1143_s18 }
  0x1c   : > { %1047 = vmatprep.mubr.msk.f32.mxu0 %vm292_vm1, %v289_v12  ;;  %v463_v14 = vsel %vm460_vm3, %v461_v10, %v462_v11  ;;  %v465_v15 = vsel %vm460_vm3, %v462_v11, %v464_v9  ;;  %1062 = vmatprep.subr.mxu1 %v1200_v17  ;;  %p1139_p11 = scmp.ne.s32.totalorder %s1354_s9, %s1138_s16  ;;  %p1146_p1 = scmp.lt.s32.totalorder %s1144_s19, %s1138_s16 }
  0x1d   : > { %1048 = vmatmul.mubr.msk.f32.vlgmr.msra.gmra.mxu0 %vm292_vm1, %v291_v13  ;;  %1063 = vmatpush3.msra.mxu1 %v580_v18 }
  0x1e   : > { %1056 = vmatpush3.msk.msra.mxu0 %vm297_vm0, %v1011_v2  ;;  %1057 = vmatprep.mubr.msk.f32.mxu0 %vm292_vm1, %v463_v14  ;;  %v889_v2 = vshrl.u32 %v888_v1, 7  ;;  %p1140_p12 = pnand %p1139_p11, %p1283_p5  ;;  %p1147_p2 = por %p1146_p1, %p1145_p0 }
  0x1f   : > { %1067 = vmatprep.subr.mxu0 %v1200_v17  ;;  %1074 = vmatprep.subr.mxu1 %v1200_v17 }
  0x20   : > { %v890_v4 = vsub.s32 0, %v889_v2  ;;  %p1141_p13 = pneg %p1140_p12 }
  0x21   : > { %1058 = vmatmul.mubr.msk.f32.vlgmr.msra.gmra.mxu0 %vm292_vm1, %v465_v15 }
  0x22   : > { %1068 = vmatpush3.msra.mxu0 %v581_v16  ;;  %1071 = vmatprep.mubr.msk.f32.mxu0 %vm1201_vm4, %v1200_v17  ;;  %p1148_p3 = pnand %p1147_p2, %p1141_p13 }
  0x23   : > { %1069 = vmatprep.subr.mxu0 %v1200_v17 }
  0x24   : > { %1070 = vmatpush3.msra.mxu0 %v580_v18 }
  0x25   : > { %1079 = vmatprep.subr.mxu0 %v1200_v17 }
  0xda   : > { %v1054_v19 = vpop.f32.mrf.mxu1 }
  0xdc   : > { %v449_v22 = vpop.f32.mrf.mxu1 }
  0xdd   : > { %v1049_v20 = vpop.f32.mrf.mxu0 }
  0xde   : > { %v455_v23 = vadd.f32 %v1054_v19, %v1049_v20 }
  0xdf   : > { %v367_v21 = vpop.f32.mrf.mxu0 }
  0xe0   : > { %v450_v26 = vadd.f32 %v449_v22, %v367_v21 }
  0xe1   : > { %v1059_v24 = vpop.f32.mrf.mxu0 }
  0xe2   : > { %v549_v27 = vadd.f32 %v1059_v24, %v455_v23 }
  0xe3   : > { %v539_v28 = vpop.f32.mrf.mxu0 }
  0xe4   : > { %v558_v29 = vadd.f32 %v1015_v25, %v549_v27  ;;  %v548_v30 = vadd.f32 %v539_v28, %v450_v26 }
  0xe6   : > { %v570_v31 = vmul.f32 %v558_v29, %v558_v29  ;;  %v557_v32 = vadd.f32 %v1015_v25, %v548_v30  ;;  %v561_v33 = vsel %vm559_vm5, %v558_v29, 0.0 }
  0xe8   : > { %v560_v34 = vsel %vm559_vm5, %v557_v32, 0.0  ;;  %v569_v35 = vmul.f32 %v557_v32, %v557_v32  ;;  %v572_v37 = vsel %vm559_vm5, %v570_v31, 0.0 }
  0xe9   : > { %v562_v36 = vadd.f32 %v561_v33, %v560_v34 }
  0xea   : > { %v571_v38 = vsel %vm559_vm5, %v569_v35, 0.0 }
  0xeb   : > { %v563_v39 = vrot.slane %v562_v36, 4  ;;  %v573_v40 = vadd.f32 %v572_v37, %v571_v38 }
  0xed   : > { %v564_v41 = vadd.f32 %v563_v39, %v562_v36  ;;  %v574_v42 = vrot.slane %v573_v40, 4 }
  0xef   : > { %v565_v43 = vrot.slane %v564_v41, 2  ;;  %v575_v44 = vadd.f32 %v574_v42, %v573_v40 }
  0xf1   : > { %v566_v45 = vadd.f32 %v565_v43, %v564_v41  ;;  %v576_v46 = vrot.slane %v575_v44, 2 }
  0xf3   : > { %v567_v47 = vrot.slane %v566_v45, 1  ;;  %v577_v48 = vadd.f32 %v576_v46, %v575_v44 }
  0xf5   : > { %v568_v49 = vadd.f32 %v567_v47, %v566_v45  ;;  %v578_v50 = vrot.slane %v577_v48, 1 }
  0xf7   : > { %1065 = vmatmul.mubr.msk.f32.vlgmr.msra.gmra.mxu1 %vm559_vm5, %v568_v49  ;;  %v579_v51 = vadd.f32 %v578_v50, %v577_v48 }
  0xf8   : > { %1076 = vmatprep.mubr.msk.f32.mxu1 %vm1201_vm4, %v1200_v17  ;;  %1075 = vmatpush3.msra.mxu1 %v735_v52 }
  0xf9   : > { %1072 = vmatmul.mubr.msk.f32.vlgmr.msra.gmra.mxu0 %vm559_vm5, %v579_v51 }
  0xfa   : > { %1081 = vmatprep.mubr.msk.f32.mxu0 %vm1201_vm4, %v1200_v17  ;;  %1080 = vmatpush3.msra.mxu0 %v735_v52 }
 0x1b7   : > { %v651_v53 = vpop.f32.mrf.mxu1 }
 0x1b8   : > { %v656_v54 = vmul.f32 0.03125, %v651_v53 }
 0x1b9   : > { %v1066_v55 = vpop.f32.mrf.mxu1  ;;  %v726_v56 = vpop.f32.mrf.mxu0 }
 0x1ba   : > { %v731_v57 = vmul.f32 %v656_v54, %v656_v54  ;;  %v730_v58 = vmul.f32 0.03125, %v726_v56  ;;  %1077 = vmatmul.mubr.msk.f32.vlgmr.msra.gmra.mxu1 %vm736_vm6, %v656_v54 }
 0x1bb   : > { %v1073_v59 = vpop.f32.mrf.mxu0 }
 0x1bc   : > { %v732_v60 = vsub.f32 %v730_v58, %v731_v57 }
 0x1be   : > { %v733_v61 = vadd.f32 1e-05, %v732_v60 }
 0x1c0   : > { %1128 = vrsqrt.f32 %v733_v61 }
 0x1cd   : > { %v1129_v62 = vpop.eup %1128 }
 0x1ce   : > { %1082 = vmatmul.mubr.msk.f32.vlgmr.msra.gmra.mxu0 %vm736_vm6, %v1129_v62 }
 0x27a   : > { %v806_v63 = vpop.f32.mrf.mxu1 }
 0x27c   : > { %v1078_v0 = vpop.f32.mrf.mxu1 }
 0x28e   : > { %v879_v5 = vpop.f32.mrf.mxu0 }
 0x28f   : > { %v884_v6 = vmul.f32 %v883_v3, %v879_v5 }
 0x290   : > { %v1083_v8 = vpop.f32.mrf.mxu0 }
 0x291   : > { %v886_v9 = vmul.f32 %v884_v6, %v806_v63  ;;  %v891_v10 = vrot.slane %v884_v6, %v890_v4 }
 0x293   : > { %v887_v11 = vsub.f32 %v885_v7, %v886_v9  ;;  %v892_v12 = vmul.f32 %v891_v10, %v557_v32  ;;  %v893_v13 = vmul.f32 %v891_v10, %v558_v29 }
 0x295   : > { %v898_v14 = vrot.slane %v887_v11, %v890_v4 }
 0x297   : > { %v900_v15 = vadd.f32 %v898_v14, %v892_v12  ;;  %v901_v16 = vadd.f32 %v898_v14, %v893_v13 }
 0x299   : > { %v902_v17 = vmin.f32 %v900_v15, 20.0  ;;  %v903_v18 = vmin.f32 %v901_v16, 20.0 }
 0x29b   : > { %v904_v19 = vmul.f32 1.442695, %v902_v17  ;;  %v906_v20 = vmul.f32 1.442695, %v903_v18 }
 0x29d   : > { %1130 = vpow2.f32 %v904_v19 }
 0x29e   : > { %1132 = vpow2.f32 %v906_v20 }
 0x2aa   : > { %v1131_v21 = vpop.eup %1130 }
 0x2ab   : > { %v1133_v22 = vpop.eup %1132  ;;  %v908_v23 = vadd.f32 2.0, %v1131_v21 }
 0x2ac   : > { %v909_v24 = vadd.f32 2.0, %v1133_v22 }
 0x2ad   : > { %v910_v25 = vmul.f32 %v1131_v21, %v908_v23 }
 0x2ae   : > { %v911_v26 = vmul.f32 %v1133_v22, %v909_v24 }
 0x2af   : > { %v912_v27 = vadd.f32 2.0, %v910_v25 }
 0x2b0   : > { %v913_v28 = vadd.f32 2.0, %v911_v26 }
 0x2b1   : > { %1134 = vrcp.f32 %v912_v27 }
 0x2b2   : > { %1136 = vrcp.f32 %v913_v28 }
 0x2be   : > { %v1135_v29 = vpop.eup %1134 }
 0x2bf   : > { %v1137_v30 = vpop.eup %1136  ;;  %v915_v31 = vmul.f32 %v1135_v29, %v910_v25 }
 0x2c0   : > { %v917_v32 = vmul.f32 %v1137_v30, %v911_v26 }
 0x2c1   : > { %v918_v33 = vmul.f32 %v915_v31, %v900_v15 }
 0x2c2   : > { %v919_v34 = vmul.f32 %v917_v32, %v901_v16 }
 0x2c3   : > { %920 = vst.msk [vmem:[%s271_s8] sm:$0xff] %vm559_vm5, %v918_v33 }
 0x2c4   : > { %921 = vst.msk [vmem:[%s271_s8 + $0x8] sm:$0xff] %vm559_vm5, %v919_v34 }
 0x2c5   : > { %1151 = shalt.err (!%p1148_p3)
}
 0x2c6   : > { %s1152_s20 = scalar_lea.hbm %s1352_s15, 256  ;;  %s1156_s23 = scalar_lea.hbm %s1405_s7, 512 }
 0x2c7   : > { %p1153_p4 = scmp.ne.s32.totalorder %s1352_s15, %s1152_s20  ;;  %p1157_p9 = scmp.lt.s32.totalorder %s1352_s15, %s1405_s7 }
 0x2c8   : > { %p1158_p10 = scmp.lt.s32.totalorder %s1156_s23, %s1152_s20 }
 0x2c9   : > { %p1154_p7 = pnand %p1153_p4, %p1283_p5 }
 0x2ca   : > { %p1159_p11 = por %p1158_p10, %p1157_p9 }
 0x2cb   : > { %p1155_p8 = pneg %p1154_p7 }
 0x2cd   : > { %p1160_p12 = pnand %p1159_p11, %p1155_p8 }
 0x2cf   : > { %1163 = shalt.err (!%p1160_p12)
}
 0x2d0   : > { %s1203_s13 = smov 128   ;;  %s1204_s14 = smov 8  }
 0x2d1   : > { %1085 = dma.vmem_to_hbm [thread:$0]  (%p1283_p5), %s1354_s9, 256, %s1352_s15, %s1358_s28, %s1203_s13, %s1203_s13, %s1204_s14  }
 0x2d2 PF: > { %p1091_p13 = scmp.ge.s32.totalorder %s1198_s27, 2  ;;  %s951_s16 = sand.u32 1, %s1186_s24  }
 0x2d3   : > { %s952_s17 = scalar_lea.sflag [#allocation3], %s951_s16 }
 0x2d4   : > { %p1088_p0 = pnand %p1091_p13, %p1287_p6 }
 0x2d6   : > { %p1089_p1 = pneg %p1088_p0 }
 0x2d8   : > { %1181 = dma.done.wait (%p1089_p1), %s952_s17, 256  }
 0x2d9   : > { %1183 = vsyncadd (%p1089_p1), %s952_s17, 4294967040  ;;  %p17_p2 = scmp.ge.s32.totalorder %s1270_s30, 4   ;;  %s1408_s24 = smov %s1190_s25 }
 0x2da   : > { %s1409_s25 = smov %s1194_s26  ;;  %s1410_s26 = smov %s1281_s10 }
 0x2db   : > { %s1411_s27 = smov %s1270_s30  ;;  %19 = sbr.rel (!%p17_p2) target bundleno = 3 (0x3), region = 85 }
 0x2e0   :  { %957 = vsyncpa [#allocation3], 1 }
 0x2e1   :  { %959 = vsyncpa [#allocation3 + $0x1], 1 }

</bundles_post_ra>
